<compile_context>
chip_gen: v7x
topology: tpu7x:2x2x1
jax: 0.10.0
libtpu: 0.0.40
codegen_flags: <defaults>
</compile_context>

<pallas_src>
import functools

import jax
import jax.numpy as jnp
from jax import lax
from jax.experimental import pallas as pl
from jax.experimental.pallas import tpu as pltpu


def _annotator_kernel(am_ref, h_ref,
                      wqkv_ref, bqkv_ref,
                      w1_ref, b1_ref, w2_ref, b2_ref,
                      out_ref, *, inv_temperature, label_size):
    Bt, S, E = h_ref.shape
    Lp = out_ref.shape[-1]
    M = Bt * S

    # Flatten (Bt, S) -> M rows so the projections/head are single MXU passes.
    h2 = h_ref[...].reshape(M, E)

    # Fused QKV projection: one matmul with N = 3E (nn.Linear: x @ W^T + b,
    # weights already stored as (in, out)).
    qkv = jnp.dot(h2, wqkv_ref[...],
                  preferred_element_type=jnp.float32) + bqkv_ref[0]
    qkv3 = qkv.reshape(Bt, S, 3 * E)
    q = qkv3[..., 0:E]
    k = qkv3[..., E:2 * E]
    v = qkv3[..., 2 * E:3 * E]
    # v_drop is Dropout(0.5) -> identity in eval mode.

    # Attention scores: contract the embed dim of q and k directly (batched
    # dot_general) -> no explicit k transpose is materialized.
    w = jnp.einsum("bqe,bke->bqk", q, k,
                   preferred_element_type=jnp.float32)          # (Bt, S, S)

    # Causal mask == self.bias[:, ns-nd:ns, :ns] with nd == ns == S.
    rows = lax.broadcasted_iota(jnp.int32, (S, S), 0)
    cols = lax.broadcasted_iota(jnp.int32, (S, S), 1)
    w = jnp.where((rows >= cols)[None], w, jnp.float32(-10000.0))

    # Additive attention mask (precomputed in the wrapper as (1-mask)*-1e4),
    # broadcast over the query axis — kept additive to match PyTorch exactly.
    w = w + am_ref[...][:, None, :]

    # Softmax over keys, numerically stable; reciprocal on the EUP path.
    w = w - jnp.max(w, axis=-1, keepdims=True)
    ew = jnp.exp(w)
    p = ew * pl.reciprocal(jnp.sum(ew, axis=-1, keepdims=True), approx=True)

    # Attention-weighted value mix: (Bt,S,S) @ (Bt,S,E) -> (Bt,S,E)
    ctx = jnp.einsum("bqk,bke->bqe", p.astype(v.dtype), v,
                     preferred_element_type=jnp.float32)
    ctx2 = ctx.reshape(M, E).astype(w1_ref.dtype)

    # Head: Linear(E, 64) -> ReLU -> Dropout(identity) -> Linear(64, Lp)
    h1 = jnp.maximum(
        jnp.dot(ctx2, w1_ref[...], preferred_element_type=jnp.float32)
        + b1_ref[0], 0.0)
    logits = jnp.dot(h1.astype(w2_ref.dtype), w2_ref[...],
                     preferred_element_type=jnp.float32) + b2_ref[0]  # (M, Lp)

    # Final F.softmax(hidden / temperature, dim=-1); padded label lanes are
    # pushed to -1e30 so they contribute exactly zero probability.
    logits = logits * jnp.float32(inv_temperature)
    lane = lax.broadcasted_iota(jnp.int32, logits.shape, 1)
    logits = jnp.where(lane < label_size, logits, jnp.float32(-1e30))
    logits = logits - jnp.max(logits, axis=-1, keepdims=True)
    el = jnp.exp(logits)
    probs = el * pl.reciprocal(jnp.sum(el, axis=-1, keepdims=True), approx=True)

    out_ref[...] = probs.reshape(Bt, S, Lp).astype(out_ref.dtype)


def annotator_forward(hidden, attention_mask, params, *, temperature=1.0,
                      batch_block=None, compute_dtype=jnp.float32):
    """hidden: (B, S, E), attention_mask: (B, S) (1 = keep, 0 = pad)."""
    B, S, E = hidden.shape
    H = params["w1"].shape[1]
    L = params["w2"].shape[1]
    Lp = pl.cdiv(L, 128) * 128          # lane-dense output / final matmul N-dim

    if batch_block is None:
        batch_block = B                 # small B -> single grid step
    assert B % batch_block == 0
    Bt = batch_block

    # Fused QKV weight/bias; head weight/bias zero-padded on the label dim.
    wqkv = jnp.concatenate(
        [params["wq"], params["wk"], params["wv"]], axis=1).astype(compute_dtype)
    bqkv = jnp.concatenate(
        [params["bq"], params["bk"], params["bv"]], axis=1).astype(jnp.float32)
    w1 = params["w1"].astype(compute_dtype)
    b1 = params["b1"].astype(jnp.float32)
    w2p = jnp.zeros((H, Lp), jnp.float32).at[:, :L].set(
        params["w2"].astype(jnp.float32)).astype(compute_dtype)
    b2p = jnp.zeros((1, Lp), jnp.float32).at[:, :L].set(
        params["b2"].astype(jnp.float32))

    # Additive padding bias precomputed once in the wrapper.
    add_bias = (1.0 - attention_mask.astype(jnp.float32)) * -10000.0   # (B, S)
    h_in = hidden.astype(compute_dtype)

    kernel = functools.partial(_annotator_kernel,
                               inv_temperature=1.0 / float(temperature),
                               label_size=L)

    full2 = lambda shape: pl.BlockSpec(shape, lambda b: (0, 0))

    out = pl.pallas_call(
        kernel,
        out_shape=jax.ShapeDtypeStruct((B, S, Lp), jnp.float32),
        grid_spec=pltpu.PrefetchScalarGridSpec(
            num_scalar_prefetch=0,
            grid=(B // Bt,),
            in_specs=[
                pl.BlockSpec((Bt, S), lambda b: (b, 0)),        # additive mask
                pl.BlockSpec((Bt, S, E), lambda b: (b, 0, 0)),  # hidden
                full2((E, 3 * E)), full2((1, 3 * E)),           # fused QKV
                full2((E, H)), full2((1, H)),                   # head linear 1
                full2((H, Lp)), full2((1, Lp)),                 # head linear 2 (padded)
            ],
            out_specs=pl.BlockSpec((Bt, S, Lp), lambda b: (b, 0, 0)),
        ),
        compiler_params=pltpu.CompilerParams(
            dimension_semantics=("parallel",)),
    )(add_bias, h_in, wqkv, bqkv, w1, b1, w2p, b2p)

    return out[..., :L]


def _reference_forward(hidden, attention_mask, params, *, temperature=1.0):
    """Plain-JAX reference mirroring the PyTorch Attn + final softmax."""
    q = hidden @ params["wq"] + params["bq"][0]
    k = hidden @ params["wk"] + params["bk"][0]
    v = hidden @ params["wv"] + params["bv"][0]
    w = jnp.einsum("bqe,bke->bqk", q, k)
    S = w.shape[-1]
    causal = jnp.tril(jnp.ones((S, S), dtype=bool))
    w = jnp.where(causal[None], w, -10000.0)
    w = w + ((1.0 - attention_mask) * -10000.0)[:, None, :]
    w = jax.nn.softmax(w, axis=-1)
    ctx = jnp.einsum("bqk,bke->bqe", w, v)
    h1 = jax.nn.relu(ctx @ params["w1"] + params["b1"][0])
    logits = h1 @ params["w2"] + params["b2"][0]
    return jax.nn.softmax(logits / temperature, axis=-1)


if __name__ == "__main__":
    # Small synthetic shapes consistent with the module's forward.
    B, S = 2, 8            # batch, sequence
    E, H, L = 32, 64, 10   # embed_size, head hidden (fixed 64), label_size
    VOCAB = 50

    key = jax.random.PRNGKey(0)
    ks = jax.random.split(key, 10)

    # Deterministic "encoder": token embedding table stand-in for GPT-2.
    embed_table = jax.random.normal(ks[0], (VOCAB, E), dtype=jnp.float32) * 0.1
    tokens = jax.random.randint(ks[1], (B, S), 0, VOCAB)
    attention_mask = jnp.concatenate(
        [jnp.ones((B, S - 2), jnp.float32), jnp.zeros((B, 2), jnp.float32)], axis=1)

    hidden = embed_table[tokens]  # (B, S, E)  -- glue, not the hot path

    def lin_init(k, fan_in, fan_out):
        kw, kb = jax.random.split(k)
        bound = 1.0 / jnp.sqrt(fan_in)
        w = jax.random.uniform(kw, (fan_in, fan_out), jnp.float32, -bound, bound)
        b = jax.random.uniform(kb, (1, fan_out), jnp.float32, -bound, bound)
        return w, b

    wq, bq = lin_init(ks[2], E, E)
    wk, bk = lin_init(ks[3], E, E)
    wv, bv = lin_init(ks[4], E, E)
    w1, b1 = lin_init(ks[5], E, H)
    w2, b2 = lin_init(ks[6], H, L)
    params = dict(wq=wq, bq=bq, wk=wk, bk=bk, wv=wv, bv=bv,
                  w1=w1, b1=b1, w2=w2, b2=b2)

    ref = _reference_forward(hidden, attention_mask, params, temperature=1.0)

    # f32 MXU-input path (only approximation is the EUP reciprocal).
    out = annotator_forward(hidden, attention_mask, params, temperature=1.0)
    out = jax.block_until_ready(out)
    assert out.shape == (B, S, L)
    assert jnp.allclose(out, ref, atol=5e-3, rtol=1e-2), \
        f"f32 path mismatch: {jnp.max(jnp.abs(out - ref))}"

    # bf16 MXU-input path (halved HBM traffic / doubled MXU rate; f32 accum).
    out_bf16 = annotator_forward(hidden, attention_mask, params,
                                 temperature=1.0, compute_dtype=jnp.bfloat16)
    out_bf16 = jax.block_until_ready(out_bf16)
    assert out_bf16.shape == (B, S, L)
    assert jnp.allclose(out_bf16, ref, atol=5e-2, rtol=5e-2), \
        f"bf16 path mismatch: {jnp.max(jnp.abs(out_bf16 - ref))}"

    print("KERNEL_OK")
</pallas_src>

<mosaic_0001>
module attributes {stable_mosaic.version = 11 : i64} {
  func.func @_annotator_kernel(%arg0: i32, %arg1: memref<2x8xf32, #tpu.memory_space<vmem>>, %arg2: memref<2x8x32xf32, #tpu.memory_space<vmem>>, %arg3: memref<32x96xf32, #tpu.memory_space<vmem>>, %arg4: memref<1x96xf32, #tpu.memory_space<vmem>>, %arg5: memref<32x64xf32, #tpu.memory_space<vmem>>, %arg6: memref<1x64xf32, #tpu.memory_space<vmem>>, %arg7: memref<64x128xf32, #tpu.memory_space<vmem>>, %arg8: memref<1x128xf32, #tpu.memory_space<vmem>>, %arg9: memref<2x8x128xf32, #tpu.memory_space<vmem>>) attributes {dimension_semantics = [#tpu.dimension_semantics<parallel>], iteration_bounds = array<i64: 1>, scalar_prefetch = 0 : i64, scratch_operands = 0 : i64, tpu.core_type = #tpu.core_type<tc>, window_params = [{transform_indices = @transform_0, window_bounds = array<i64: 2, 8>}, {transform_indices = @transform_1, window_bounds = array<i64: 2, 8, 32>}, {pipeline_mode = #tpu.pipeline_mode<synchronous>, transform_indices = @transform_2, window_bounds = array<i64: 32, 96>}, {pipeline_mode = #tpu.pipeline_mode<synchronous>, transform_indices = @transform_3, window_bounds = array<i64: 1, 96>}, {pipeline_mode = #tpu.pipeline_mode<synchronous>, transform_indices = @transform_4, window_bounds = array<i64: 32, 64>}, {pipeline_mode = #tpu.pipeline_mode<synchronous>, transform_indices = @transform_5, window_bounds = array<i64: 1, 64>}, {pipeline_mode = #tpu.pipeline_mode<synchronous>, transform_indices = @transform_6, window_bounds = array<i64: 64, 128>}, {pipeline_mode = #tpu.pipeline_mode<synchronous>, transform_indices = @transform_7, window_bounds = array<i64: 1, 128>}, {transform_indices = @transform_8, window_bounds = array<i64: 2, 8, 128>}]} {
    %c0 = arith.constant 0 : index
    %c0_0 = arith.constant 0 : index
    %c0_1 = arith.constant 0 : index
    %0 = vector.load %arg2[%c0, %c0_0, %c0_1] : memref<2x8x32xf32, #tpu.memory_space<vmem>>, vector<2x8x32xf32>
    %1 = vector.shape_cast %0 : vector<2x8x32xf32> to vector<16x32xf32>
    %c0_2 = arith.constant 0 : index
    %c0_3 = arith.constant 0 : index
    %2 = vector.load %arg3[%c0_2, %c0_3] : memref<32x96xf32, #tpu.memory_space<vmem>>, vector<32x96xf32>
    %cst = arith.constant dense<0.000000e+00> : vector<16x96xf32>
    %3 = tpu.matmul %1, %2, %cst {dimension_numbers = #tpu.dot_dimension_numbers<[1], [0], [0], [1], [0, 0, 1, 1], [], []>} : vector<16x32xf32>, vector<32x96xf32>, vector<16x96xf32> -> vector<16x96xf32>
    %c0_4 = arith.constant 0 : index
    %c0_5 = arith.constant 0 : index
    %4 = vector.load %arg4[%c0_4, %c0_5] : memref<1x96xf32, #tpu.memory_space<vmem>>, vector<1x96xf32>
    %5 = vector.shape_cast %4 : vector<1x96xf32> to vector<96xf32>
    %6 = vector.shape_cast %5 : vector<96xf32> to vector<1x96xf32>
    %7 = vector.broadcast %6 : vector<1x96xf32> to vector<16x96xf32>
    %8 = arith.addf %3, %7 : vector<16x96xf32>
    %9 = vector.shape_cast %8 : vector<16x96xf32> to vector<2x8x96xf32>
    %10 = vector.extract_strided_slice %9 {offsets = [0, 0, 0], sizes = [2, 8, 32], strides = [1, 1, 1]} : vector<2x8x96xf32> to vector<2x8x32xf32>
    %11 = vector.extract_strided_slice %9 {offsets = [0, 0, 32], sizes = [2, 8, 32], strides = [1, 1, 1]} : vector<2x8x96xf32> to vector<2x8x32xf32>
    %12 = vector.extract_strided_slice %9 {offsets = [0, 0, 64], sizes = [2, 8, 32], strides = [1, 1, 1]} : vector<2x8x96xf32> to vector<2x8x32xf32>
    "tpu.trace_start"() <{level = 10 : i32, message = "bqe,bke->bqk"}> : () -> ()
    %cst_6 = arith.constant dense<0.000000e+00> : vector<2x8x8xf32>
    %13 = tpu.matmul %10, %11, %cst_6 {dimension_numbers = #tpu.dot_dimension_numbers<[2], [2], [1], [1], [0, 0, 0, 1, 1, 1], [0], [0]>} : vector<2x8x32xf32>, vector<2x8x32xf32>, vector<2x8x8xf32> -> vector<2x8x8xf32>
    "tpu.trace_stop"() : () -> ()
    %14 = tpu.iota {dimensions = array<i32: 0>} : vector<8x8xi32>
    %15 = tpu.iota {dimensions = array<i32: 1>} : vector<8x8xi32>
    %16 = arith.cmpi sge, %14, %15 : vector<8x8xi32>
    %17 = vector.shape_cast %16 : vector<8x8xi1> to vector<1x8x8xi1>
    %cst_7 = arith.constant -1.000000e+04 : f32
    %18 = vector.shape_cast %17 : vector<1x8x8xi1> to vector<1x8x8xi1>
    %19 = vector.broadcast %18 : vector<1x8x8xi1> to vector<2x8x8xi1>
    %20 = vector.broadcast %cst_7 : f32 to vector<2x8x8xf32>
    %21 = arith.select %19, %13, %20 : vector<2x8x8xi1>, vector<2x8x8xf32>
    %c0_8 = arith.constant 0 : index
    %c0_9 = arith.constant 0 : index
    %22 = vector.load %arg1[%c0_8, %c0_9] : memref<2x8xf32, #tpu.memory_space<vmem>>, vector<2x8xf32>
    %23 = vector.shape_cast %22 : vector<2x8xf32> to vector<2x1x8xf32>
    %24 = vector.broadcast %23 : vector<2x1x8xf32> to vector<2x8x8xf32>
    %25 = arith.addf %21, %24 : vector<2x8x8xf32>
    %cst_10 = arith.constant dense<0xFF800000> : vector<2x8xf32>
    %26 = vector.multi_reduction <maximumf>, %25, %cst_10 [2] : vector<2x8x8xf32> to vector<2x8xf32>
    %27 = vector.shape_cast %26 : vector<2x8xf32> to vector<2x8x1xf32>
    %28 = vector.broadcast %27 : vector<2x8x1xf32> to vector<2x8x8xf32>
    %29 = arith.subf %25, %28 : vector<2x8x8xf32>
    %30 = math.exp %29 : vector<2x8x8xf32>
    %cst_11 = arith.constant dense<0.000000e+00> : vector<2x8xf32>
    %31 = vector.multi_reduction <add>, %30, %cst_11 [2] : vector<2x8x8xf32> to vector<2x8xf32>
    %32 = vector.shape_cast %31 : vector<2x8xf32> to vector<2x8x1xf32>
    %33 = tpu.reciprocal %32 {approx = true} : vector<2x8x1xf32> -> vector<2x8x1xf32>
    %34 = vector.broadcast %33 : vector<2x8x1xf32> to vector<2x8x8xf32>
    %35 = arith.mulf %30, %34 : vector<2x8x8xf32>
    "tpu.trace_start"() <{level = 10 : i32, message = "bqk,bke->bqe"}> : () -> ()
    %cst_12 = arith.constant dense<0.000000e+00> : vector<2x8x32xf32>
    %36 = tpu.matmul %35, %12, %cst_12 {dimension_numbers = #tpu.dot_dimension_numbers<[2], [1], [1], [2], [0, 0, 0, 1, 1, 2], [0], [0]>} : vector<2x8x8xf32>, vector<2x8x32xf32>, vector<2x8x32xf32> -> vector<2x8x32xf32>
    "tpu.trace_stop"() : () -> ()
    %37 = vector.shape_cast %36 : vector<2x8x32xf32> to vector<16x32xf32>
    %c0_13 = arith.constant 0 : index
    %c0_14 = arith.constant 0 : index
    %38 = vector.load %arg5[%c0_13, %c0_14] : memref<32x64xf32, #tpu.memory_space<vmem>>, vector<32x64xf32>
    %cst_15 = arith.constant dense<0.000000e+00> : vector<16x64xf32>
    %39 = tpu.matmul %37, %38, %cst_15 {dimension_numbers = #tpu.dot_dimension_numbers<[1], [0], [0], [1], [0, 0, 1, 1], [], []>} : vector<16x32xf32>, vector<32x64xf32>, vector<16x64xf32> -> vector<16x64xf32>
    %c0_16 = arith.constant 0 : index
    %c0_17 = arith.constant 0 : index
    %40 = vector.load %arg6[%c0_16, %c0_17] : memref<1x64xf32, #tpu.memory_space<vmem>>, vector<1x64xf32>
    %41 = vector.shape_cast %40 : vector<1x64xf32> to vector<64xf32>
    %42 = vector.shape_cast %41 : vector<64xf32> to vector<1x64xf32>
    %43 = vector.broadcast %42 : vector<1x64xf32> to vector<16x64xf32>
    %44 = arith.addf %39, %43 : vector<16x64xf32>
    %cst_18 = arith.constant 0.000000e+00 : f32
    %45 = vector.broadcast %cst_18 : f32 to vector<16x64xf32>
    %46 = arith.maximumf %44, %45 : vector<16x64xf32>
    %c0_19 = arith.constant 0 : index
    %c0_20 = arith.constant 0 : index
    %47 = vector.load %arg7[%c0_19, %c0_20] : memref<64x128xf32, #tpu.memory_space<vmem>>, vector<64x128xf32>
    %cst_21 = arith.constant dense<0.000000e+00> : vector<16x128xf32>
    %48 = tpu.matmul %46, %47, %cst_21 {dimension_numbers = #tpu.dot_dimension_numbers<[1], [0], [0], [1], [0, 0, 1, 1], [], []>} : vector<16x64xf32>, vector<64x128xf32>, vector<16x128xf32> -> vector<16x128xf32>
    %c0_22 = arith.constant 0 : index
    %c0_23 = arith.constant 0 : index
    %49 = vector.load %arg8[%c0_22, %c0_23] : memref<1x128xf32, #tpu.memory_space<vmem>>, vector<1x128xf32>
    %50 = vector.shape_cast %49 : vector<1x128xf32> to vector<128xf32>
    %51 = vector.shape_cast %50 : vector<128xf32> to vector<1x128xf32>
    %52 = vector.broadcast %51 : vector<1x128xf32> to vector<16x128xf32>
    %53 = arith.addf %48, %52 : vector<16x128xf32>
    %cst_24 = arith.constant 1.000000e+00 : f32
    %54 = vector.broadcast %cst_24 : f32 to vector<16x128xf32>
    %55 = arith.mulf %53, %54 : vector<16x128xf32>
    %56 = tpu.iota {dimensions = array<i32: 1>} : vector<16x128xi32>
    %c10_i32 = arith.constant 10 : i32
    %57 = vector.broadcast %c10_i32 : i32 to vector<16x128xi32>
    %58 = arith.cmpi slt, %56, %57 : vector<16x128xi32>
    %cst_25 = arith.constant -1.000000e+30 : f32
    %59 = vector.broadcast %cst_25 : f32 to vector<16x128xf32>
    %60 = arith.select %58, %55, %59 : vector<16x128xi1>, vector<16x128xf32>
    %cst_26 = arith.constant dense<0xFF800000> : vector<16xf32>
    %61 = vector.multi_reduction <maximumf>, %60, %cst_26 [1] : vector<16x128xf32> to vector<16xf32>
    %62 = vector.shape_cast %61 : vector<16xf32> to vector<16x1xf32>
    %63 = vector.broadcast %62 : vector<16x1xf32> to vector<16x128xf32>
    %64 = arith.subf %60, %63 : vector<16x128xf32>
    %65 = math.exp %64 : vector<16x128xf32>
    %cst_27 = arith.constant dense<0.000000e+00> : vector<16xf32>
    %66 = vector.multi_reduction <add>, %65, %cst_27 [1] : vector<16x128xf32> to vector<16xf32>
    %67 = vector.shape_cast %66 : vector<16xf32> to vector<16x1xf32>
    %68 = tpu.reciprocal %67 {approx = true} : vector<16x1xf32> -> vector<16x1xf32>
    %69 = vector.broadcast %68 : vector<16x1xf32> to vector<16x128xf32>
    %70 = arith.mulf %65, %69 : vector<16x128xf32>
    %71 = vector.shape_cast %70 : vector<16x128xf32> to vector<2x8x128xf32>
    %c0_28 = arith.constant 0 : index
    %c0_29 = arith.constant 0 : index
    %c0_30 = arith.constant 0 : index
    %72 = vector.load %arg9[%c0_28, %c0_29, %c0_30] : memref<2x8x128xf32, #tpu.memory_space<vmem>>, vector<2x8x128xf32>
    tpu.vector_store %arg9[%c0_28, %c0_29, %c0_30], %71 {strides = array<i32>} : memref<2x8x128xf32, #tpu.memory_space<vmem>>, vector<2x8x128xf32>,
    return
  }
  func.func @transform_0(%arg0: i32) -> (i32, i32) {
    %c0_i32 = arith.constant 0 : i32
    %c0_i32_0 = arith.constant 0 : i32
    return %arg0, %c0_i32 : i32, i32
  }
  func.func @transform_1(%arg0: i32) -> (i32, i32, i32) {
    %c0_i32 = arith.constant 0 : i32
    %c0_i32_0 = arith.constant 0 : i32
    %c0_i32_1 = arith.constant 0 : i32
    return %arg0, %c0_i32, %c0_i32_0 : i32, i32, i32
  }
  func.func @transform_2(%arg0: i32) -> (i32, i32) {
    %c0_i32 = arith.constant 0 : i32
    %c0_i32_0 = arith.constant 0 : i32
    %c0_i32_1 = arith.constant 0 : i32
    return %c0_i32, %c0_i32_0 : i32, i32
  }
  func.func @transform_3(%arg0: i32) -> (i32, i32) {
    %c0_i32 = arith.constant 0 : i32
    %c0_i32_0 = arith.constant 0 : i32
    %c0_i32_1 = arith.constant 0 : i32
    return %c0_i32, %c0_i32_0 : i32, i32
  }
  func.func @transform_4(%arg0: i32) -> (i32, i32) {
    %c0_i32 = arith.constant 0 : i32
    %c0_i32_0 = arith.constant 0 : i32
    %c0_i32_1 = arith.constant 0 : i32
    return %c0_i32, %c0_i32_0 : i32, i32
  }
  func.func @transform_5(%arg0: i32) -> (i32, i32) {
    %c0_i32 = arith.constant 0 : i32
    %c0_i32_0 = arith.constant 0 : i32
    %c0_i32_1 = arith.constant 0 : i32
    return %c0_i32, %c0_i32_0 : i32, i32
  }
  func.func @transform_6(%arg0: i32) -> (i32, i32) {
    %c0_i32 = arith.constant 0 : i32
    %c0_i32_0 = arith.constant 0 : i32
    %c0_i32_1 = arith.constant 0 : i32
    return %c0_i32, %c0_i32_0 : i32, i32
  }
  func.func @transform_7(%arg0: i32) -> (i32, i32) {
    %c0_i32 = arith.constant 0 : i32
    %c0_i32_0 = arith.constant 0 : i32
    %c0_i32_1 = arith.constant 0 : i32
    return %c0_i32, %c0_i32_0 : i32, i32
  }
  func.func @transform_8(%arg0: i32) -> (i32, i32, i32) {
    %c0_i32 = arith.constant 0 : i32
    %c0_i32_0 = arith.constant 0 : i32
    %c0_i32_1 = arith.constant 0 : i32
    return %arg0, %c0_i32, %c0_i32_0 : i32, i32, i32
  }
}

</mosaic_0001>

<bundles_post_ra>
// kernel: tpu_custom_call.1
= control target key start
LH: loop header
LB: loop body
LE: loop exit
PB: predicated region body
PF: predicated region fallthrough
CT: control target
= control target key end

     0   :  { %13 = vsyncpa [#allocation3], 0  ;;  %s1282_s0 = inlined_call_operand.hbm [shape: f32[2,8], index: 0, kind: input, shape index: {}]   ;;  %s1283_s1 = inlined_call_operand.hbm [shape: f32[2,8,32], index: 1, kind: input, shape index: {}]   ;;  %s1284_s2 = inlined_call_operand.hbm [shape: f32[32,96], index: 2, kind: input, shape index: {}]   ;;  %s1285_s3 = inlined_call_operand.vmem [shape: f32[1,96], index: 3, kind: input, shape index: {}]   ;;  %s1286_s4 = inlined_call_operand.hbm [shape: f32[32,64], index: 4, kind: input, shape index: {}]   ;;  %s1287_s5 = inlined_call_operand.vmem [shape: f32[1,64], index: 5, kind: input, shape index: {}]   ;;  %s1288_s6 = inlined_call_operand.hbm [shape: f32[64,128], index: 6, kind: input, shape index: {}]   ;;  %s1289_s7 = inlined_call_operand.vmem [shape: f32[1,128], index: 7, kind: input, shape index: {}]   ;;  %s1290_s8 = inlined_call_operand.hbm [shape: f32[2,8,128], index: 8, kind: output, shape index: {}]  }
   0x1   :  { %14 = vsyncpa [#allocation6], 0 }
   0x2   :  { %15 = vsyncpa [#allocation9], 0 }
   0x3   :  { %16 = vsyncpa [#allocation4], 0  ;;  %s1106_s27 = smov [#allocation5]   ;;  %s966_s9 = scalar_lea.hbm %s1283_s1, 256 }
   0x4   :  { %s32_s28 = sshll.u32 %s1106_s27, 4  ;;  %p967_p0 = scmp.ne.s32.totalorder %s1283_s1, %s966_s9  ;;  %s33_s28 = int_to_ptr.vmem [resolvable:$true] %s32_s28 }
   0x5   :  { %p970_p1 = scmp.lt.u32.totalorder %s966_s9, %s1283_s1 }
   0x7   :  { %p972_p2 = pnand %p970_p1, %p967_p0 }
   0x9   :  { %975 = shalt.err (!%p972_p2)
}
   0xa   :  { %s976_s14 = scalar_lea.vmem %s33_s28, 256  ;;  %p981_p4 = scmp.lt.s32.totalorder %s33_s28, %s33_s28 }
   0xb   :  { %p977_p3 = scmp.ne.s32.totalorder %s33_s28, %s976_s14  ;;  %p982_p5 = scmp.lt.s32.totalorder %s976_s14, %s976_s14 }
   0xd   :  { %p983_p6 = por %p982_p5, %p981_p4 }
   0xf   :  { %p984_p7 = pnand %p983_p6, %p977_p3 }
  0x11   :  { %987 = shalt.err (!%p984_p7)
}
  0x12   :  { %s1107_s15 = smov 128   ;;  %s1108_s16 = smov 8  }
  0x13   :  { %38 = dma.hbm_to_vmem [thread:$0]  %s1283_s1, 256, %s33_s28, [#allocation6], %s1107_s15, %s1107_s15, %s1108_s16  }
  0x14   :  { %s1109_s19 = smov [#allocation8]   ;;  %s1110_s21 = smov [#allocation2]  }
  0x15   :  { %s58_s20 = sshll.u32 %s1109_s19, 4  ;;  %s23_s22 = sshll.u32 %s1110_s21, 4  ;;  %s59_s20 = int_to_ptr.vmem [resolvable:$true] %s58_s20  ;;  %s24_s22 = int_to_ptr.vmem [resolvable:$true] %s23_s22 }
  0x16   :  { %s988_s25 = scalar_lea.hbm %s1286_s4, 512 }
  0x17   :  { %p989_p8 = scmp.ne.s32.totalorder %s1286_s4, %s988_s25  ;;  %p992_p9 = scmp.lt.u32.totalorder %s988_s25, %s1286_s4 }
  0x19   :  { %p994_p10 = pnand %p992_p9, %p989_p8 }
  0x1b   :  { %997 = shalt.err (!%p994_p10)
}
  0x1c   :  { %s998_s1 = scalar_lea.vmem %s59_s20, 512  ;;  %p1003_p12 = scmp.lt.s32.totalorder %s59_s20, %s59_s20 }
  0x1d   :  { %p999_p11 = scmp.ne.s32.totalorder %s59_s20, %s998_s1  ;;  %p1004_p13 = scmp.lt.s32.totalorder %s998_s1, %s998_s1 }
  0x1f   :  { %p1005_p0 = por %p1004_p13, %p1003_p12 }
  0x21   :  { %p1006_p1 = pnand %p1005_p0, %p999_p11 }
  0x23   :  { %1009 = shalt.err (!%p1006_p1)
}
  0x24   :  { %64 = dma.hbm_to_vmem [thread:$0]  %s1286_s4, 512, %s59_s20, [#allocation9], %s1107_s15, %s1107_s15, %s1108_s16  }
  0x25   :  { %s1010_s12 = scalar_lea.hbm %s1282_s0, 32 }
  0x26   :  { %p1011_p2 = scmp.ne.s32.totalorder %s1282_s0, %s1010_s12  ;;  %p1014_p3 = scmp.lt.u32.totalorder %s1010_s12, %s1282_s0 }
  0x28   :  { %p1016_p4 = pnand %p1014_p3, %p1011_p2 }
  0x2a   :  { %1019 = shalt.err (!%p1016_p4)
}
  0x2b   :  { %s1020_s19 = scalar_lea.vmem %s24_s22, 32  ;;  %p1025_p6 = scmp.lt.s32.totalorder %s24_s22, %s24_s22 }
  0x2c   :  { %p1021_p5 = scmp.ne.s32.totalorder %s24_s22, %s1020_s19  ;;  %p1026_p7 = scmp.lt.s32.totalorder %s1020_s19, %s1020_s19 }
  0x2e   :  { %p1027_p8 = por %p1026_p7, %p1025_p6 }
  0x30   :  { %p1028_p9 = pnand %p1027_p8, %p1021_p5 }
  0x32   :  { %1031 = shalt.err (!%p1028_p9)
}
  0x33   :  { %26 = dma.hbm_to_vmem [thread:$0]  %s1282_s0, 32, %s24_s22, [#allocation3]  }
  0x34   :  { %s1111_s21 = smov [#allocation7]   ;;  %s1112_s24 = smov [#allocation10]  }
  0x35   :  { %s44_s23 = sshll.u32 %s1111_s21, 4  ;;  %s72_s25 = sshll.u32 %s1112_s24, 4  ;;  %s45_s23 = int_to_ptr.vmem [resolvable:$true] %s44_s23  ;;  %s73_s25 = int_to_ptr.vmem [resolvable:$true] %s72_s25 }
  0x36   :  { %s1032_s29 = scalar_lea.hbm %s1284_s2, 512 }
  0x37   :  { %p1033_p10 = scmp.ne.s32.totalorder %s1284_s2, %s1032_s29  ;;  %p1036_p11 = scmp.lt.u32.totalorder %s1032_s29, %s1284_s2 }
  0x39   :  { %p1038_p12 = pnand %p1036_p11, %p1033_p10 }
  0x3b   :  { %1041 = shalt.err (!%p1038_p12)
}
  0x3c   :  { %s1042_s0 = scalar_lea.vmem %s45_s23, 512  ;;  %p1047_p0 = scmp.lt.s32.totalorder %s45_s23, %s45_s23 }
  0x3d   :  { %p1043_p13 = scmp.ne.s32.totalorder %s45_s23, %s1042_s0  ;;  %p1048_p1 = scmp.lt.s32.totalorder %s1042_s0, %s1042_s0 }
  0x3f   :  { %p1049_p2 = por %p1048_p1, %p1047_p0 }
  0x41   :  { %p1050_p3 = pnand %p1049_p2, %p1043_p13 }
  0x43   :  { %1053 = shalt.err (!%p1050_p3)
}
  0x44   :  { %50 = dma.hbm_to_vmem [thread:$0]  %s1284_s2, 512, %s45_s23, [#allocation6], %s1107_s15, %s1107_s15, %s1108_s16  }
  0x45   :  { %s1054_s13 = scalar_lea.hbm %s1288_s6, 1024 }
  0x46   :  { %p1055_p4 = scmp.ne.s32.totalorder %s1288_s6, %s1054_s13  ;;  %p1058_p5 = scmp.lt.u32.totalorder %s1054_s13, %s1288_s6 }
  0x48   :  { %p1060_p6 = pnand %p1058_p5, %p1055_p4 }
  0x4a   :  { %1063 = shalt.err (!%p1060_p6)
}
  0x4b   :  { %s1064_s4 = scalar_lea.vmem %s73_s25, 1024  ;;  %p1069_p8 = scmp.lt.s32.totalorder %s73_s25, %s73_s25 }
  0x4c   :  { %p1065_p7 = scmp.ne.s32.totalorder %s73_s25, %s1064_s4  ;;  %p1070_p9 = scmp.lt.s32.totalorder %s1064_s4, %s1064_s4 }
  0x4e   :  { %p1071_p10 = por %p1070_p9, %p1069_p8 }
  0x50   :  { %p1072_p11 = pnand %p1071_p10, %p1065_p7 }
  0x52   :  { %1075 = shalt.err (!%p1072_p11)
}
  0x53   :  { %78 = dma.hbm_to_vmem [thread:$0]  %s1288_s6, 1024, %s73_s25, [#allocation9], %s1107_s15, %s1107_s15, %s1108_s16  }
  0x54   :  { %1098 = dma.done.wait [#allocation3], 32  }
  0x55   :  { %1099 = vsyncadd [#allocation3], 4294967264 }
  0x56   :  { %1100 = dma.done.wait [#allocation6], 768  }
  0x57   :  { %1101 = vsyncadd [#allocation6], 4294966528 }
  0x58   :  { %1102 = dma.done.wait [#allocation9], 1536  }
  0x59   :  { %1103 = vsyncadd [#allocation9], 4294965760  ;;  %vm109_vm0 = vcmask 261120   ;;  %v98_v0 = vld [vmem:[#allocation7] sm:$0xff]  ;;  %v99_v1 = vld [vmem:[#allocation7 + $0x8] sm:$0xff]  ;;  %v1113_v8 = vmov 0.0   ;;  %v345_v16 = vlaneseq }
  0x5a   :  { %v100_v2 = vld [vmem:[#allocation7 + $0x10] sm:$0xff]  ;;  %v905_v3 = vpack.c.bf16 %v99_v1, %v98_v0  ;;  %v101_v4 = vld [vmem:[#allocation7 + $0x18] sm:$0xff]  ;;  %860 = vmatprep.subr.mxu1 %v1113_v8  ;;  %vm1114_vm1 = vmmov 0   ;;  %v798_v9 = vld [vmem:[%s1285_s3] ss:$0 sm:$0xff]  ;;  %s1115_s23 = smov 96  }
  0x5b   :  { %v96_v5 = vld [vmem:[#allocation5] sm:$0xff]  ;;  %v909_v6 = vpack.c.bf16 %v101_v4, %v100_v2  ;;  %v97_v7 = vld [vmem:[#allocation5 + $0x8] sm:$0xff]  ;;  %862 = vmatprep.mubr.msk.f32.mxu1 %vm1114_vm1, %v1113_v8  ;;  %v1116_v17 = vmov 1966171168   ;;  %v346_v19 = vshrl.u32 %v345_v16, 7  ;;  %v1249_v23 = vand.u32 127, %v345_v16 }
  0x5c   :  { %852 = vmatprep.mubr.msk.f32.mxu0 %vm109_vm0, %v96_v5  ;;  %906 = vmatprep.subr.bf16.mxu0 %v905_v3  ;;  %v365_v18 = vunpack.c.l.s4 %v1116_v17  ;;  %v805_v22 = vld.sshfl [vmem:[#allocation2] sm:$0x11 pattern:$0x75316420]  ;;  %vm390_vm3 = vcmask 64512   ;;  %s1117_s3 = smov 64  }
  0x5d   :  { %908 = vmatpush3.bf16.msra.mxu0 %v905_v3  ;;  %v380_v25 = vsub.s32 0, %v346_v19  ;;  %v363_v26 = vcombine.high %v805_v22, %v805_v22  ;;  %vm349_vm2 = vcmp.ge.s32.totalorder %v346_v19, %v1249_v23  ;;  %v565_v51 = vld [vmem:[#allocation8] sm:$0xff]  ;;  %v566_v52 = vld [vmem:[#allocation8 + $0x8] sm:$0xff]  ;;  %v567_v61 = vld [vmem:[#allocation8 + $0x10] sm:$0xff]  ;;  %vm674_vm4 = vcmask 523264  }
  0x5e   :  { %910 = vmatprep.subr.bf16.mxu0 %v909_v6  ;;  %v366_v20 = vunpack.c.0.s8 %v365_v18  ;;  %v913_v54 = vpack.c.bf16 %v566_v52, %v565_v51  ;;  %v568_v62 = vld [vmem:[#allocation8 + $0x18] sm:$0xff]  ;;  %v659_v0 = vld [vmem:[#allocation10] sm:$0xff]  ;;  %v660_v1 = vld [vmem:[#allocation10 + $0x8] sm:$0xff]  ;;  %vm756_vm5 = vcmp.lt.s32.totalorder %v1249_v23, 10 }
  0x5f   :  { %v917_v63 = vpack.c.bf16 %v568_v62, %v567_v61  ;;  %v661_v2 = vld [vmem:[#allocation10 + $0x10] sm:$0xff]  ;;  %v921_v3 = vpack.c.bf16 %v660_v1, %v659_v0  ;;  %v662_v4 = vld [vmem:[#allocation10 + $0x18] sm:$0xff]  ;;  %v808_v16 = vld [vmem:[%s1287_s5] ss:$0 sm:$0xff]  ;;  %s1118_s5 = smov [#allocation11]  }
  0x60   :  { %v369_v21 = vsub.s32 %v366_v20, %v346_v19  ;;  %v925_v5 = vpack.c.bf16 %v662_v4, %v661_v2 }
  0x61   :  { %912 = vmatpush3.bf16.msra.mxu0 %v909_v6  ;;  %v663_v6 = vld [vmem:[#allocation10 + $0x20] sm:$0xff] }
  0x62   :  { %855 = vmatprep.subr.mxu0 %v1113_v8  ;;  %v370_v24 = vrot.slane %v805_v22, %v369_v21  ;;  %v377_v28 = vrot.slane %v363_v26, %v369_v21 }
  0x64   :  { %853 = vmatmul.mubr.msk.f32.vlgmr.msra.gmra.mrb[0].mxu0 %vm109_vm0, %v97_v7  ;;  %v381_v27 = vrot.slane %v370_v24, %v380_v25  ;;  %v385_v33 = vrot.slane %v377_v28, %v380_v25  ;;  %v664_v7 = vld [vmem:[#allocation10 + $0x28] sm:$0xff] }
  0x65   :  { %857 = vmatprep.mubr.msk.f32.mxu0 %vm1114_vm1, %v1113_v8  ;;  %v811_v24 = vld [vmem:[%s1289_s7] ss:$0 sm:$0xff]  ;;  %s784_s7 = sshll.u32 %s1118_s5, 4  ;;  %s785_s7 = int_to_ptr.vmem [resolvable:$true] %s784_s7 }
  0x66   :  { %s1076_s29 = scalar_lea.vmem %s785_s7, 256  ;;  %p1081_p13 = scmp.lt.s32.totalorder %s785_s7, %s785_s7 }
  0x67   :  { %p1077_p12 = scmp.ne.s32.totalorder %s785_s7, %s1076_s29  ;;  %p1082_p0 = scmp.lt.s32.totalorder %s1076_s29, %s1076_s29 }
  0x69   :  { %p1083_p1 = por %p1082_p0, %p1081_p13 }
  0x6b   :  { %p1084_p2 = pnand %p1083_p1, %p1077_p12 }
 0x137   :  { %v854_v10 = vpop.f32.mrb[0].mxu0 }
 0x138   :  { %v182_v11 = vpop.f32.mrb[1].mxu0  ;;  %v188_v13 = vadd.f32 %v854_v10, %v798_v9 }
 0x139   :  { %v183_v12 = vadd.f32 %v798_v9, %v182_v11 }
 0x13b   :  { %192 = vrot.lane.b32.xlu0 %v183_v12, %s1115_s23 }
 0x13f   :  { %269 = vrot.lane.b32.xlu0 %v188_v13, %s1115_s23 }
 0x1ad   :  { %v193_v14 = vpop.permute.xlu0 %192 }
 0x1ae   :  { %856 = vmatpush3.xpose.msk.msra.mxu0 %vm109_vm0, %v193_v14  ;;  %v666_v14 = vld [vmem:[#allocation10 + $0x38] sm:$0xff] }
 0x1af   :  { %865 = vmatprep.subr.mxu0 %v1113_v8 }
 0x1b1   :  { %858 = vmatmul.mubr.msk.f32.vlgmr.msra.gmra.mrb[2].mxu0 %vm109_vm0, %v183_v12  ;;  %v270_v15 = vpop.permute.xlu0 %269 }
 0x1b2   :  { %861 = vmatpush3.xpose.msk.msra.mxu1 %vm109_vm0, %v270_v15  ;;  %867 = vmatprep.mubr.msk.f32.mxu0 %vm1114_vm1, %v1113_v8 }
 0x1b3   :  { %870 = vmatprep.subr.mxu1 %v1113_v8 }
 0x1b5   :  { %863 = vmatmul.mubr.msk.f32.vlgmr.msra.gmra.mrb[0].mxu1 %vm109_vm0, %v188_v13 }
 0x1b6   :  { %872 = vmatprep.mubr.msk.f32.mxu1 %vm1114_vm1, %v1113_v8  ;;  %v929_v8 = vpack.c.bf16 %v664_v7, %v663_v6 }
 0x284   :  { %v264_v29 = vpop.f32.mrb[2].mxu0 }
 0x285   :  { %v352_v30 = vsel %vm349_vm2, %v264_v29, -10000.0  ;;  %v859_v31 = vpop.f32.mrb[3].mxu0 }
 0x286   :  { %v388_v32 = vadd.f32 %v381_v27, %v352_v30 }
 0x288   :  { %v341_v34 = vpop.f32.mrb[0].mxu1  ;;  %v391_v35 = vsel %vm390_vm3, %v388_v32, -inf }
 0x289   :  { %v353_v36 = vsel %vm349_vm2, %v341_v34, -10000.0  ;;  %392 = vmax.xlane.f32.xlu1 %v391_v35  ;;  %v864_v37 = vpop.f32.mrb[1].mxu1 }
 0x28a   :  { %v389_v38 = vadd.f32 %v385_v33, %v353_v36 }
 0x28c   :  { %v394_v39 = vsel %vm390_vm3, %v389_v38, -inf }
 0x28d   :  { %395 = vmax.xlane.f32.xlu1 %v394_v39 }
 0x316   :  { %v393_v40 = vpop.xlane.xlu1 %392 }
 0x317   :  { %v397_v41 = vsub.f32 %v388_v32, %v393_v40 }
 0x319   :  { %v399_v42 = vmul.f32 1.442695, %v397_v41 }
 0x31a   :  { %v396_v43 = vpop.xlane.xlu1 %395 }
 0x31b   :  { %950 = vpow2.f32 %v399_v42  ;;  %v398_v44 = vsub.f32 %v389_v38, %v396_v43 }
 0x31d   :  { %v401_v45 = vmul.f32 1.442695, %v398_v44 }
 0x31f   :  { %952 = vpow2.f32 %v401_v45 }
 0x325   :  { %v951_v46 = vpop.eup %950 }
 0x326   :  { %v403_v47 = vsel %vm390_vm3, %v951_v46, 0.0 }
 0x327   :  { %404 = vadd.xlane.f32.xlu0 %v403_v47 }
 0x329   :  { %v953_v48 = vpop.eup %952 }
 0x32a   :  { %v406_v49 = vsel %vm390_vm3, %v953_v48, 0.0 }
 0x32b   :  { %407 = vadd.xlane.f32.xlu1 %v406_v49 }
 0x33c   :  { %413 = vrot.lane.b32.xlu1 %v183_v12, %s1117_s3 }
 0x340   :  { %489 = vrot.lane.b32.xlu1 %v188_v13, %s1117_s3  ;;  %v665_v13 = vld [vmem:[#allocation10 + $0x30] sm:$0xff] }
 0x341   :  { %v933_v15 = vpack.c.bf16 %v666_v14, %v665_v13 }
 0x3b4   :  { %v405_v50 = vpop.xlane.xlu0 %404 }
 0x3b5   :  { %954 = vrcp.f32 %v405_v50 }
 0x3b8   :  { %v408_v53 = vpop.xlane.xlu1 %407 }
 0x3b9   :  { %956 = vrcp.f32 %v408_v53 }
 0x3bc   :  { %v414_v55 = vpop.permute.xlu1 %413 }
 0x3bd   :  { %866 = vmatpush3.msra.mxu0 %v414_v55 }
 0x3be   :  { %914 = vmatprep.subr.bf16.mxu0 %v913_v54 }
 0x3bf   :  { %v955_v56 = vpop.eup %954 }
 0x3c0   :  { %v411_v57 = vmul.f32 %v955_v56, %v951_v46  ;;  %v490_v58 = vpop.permute.xlu1 %489 }
 0x3c1   :  { %871 = vmatpush3.msra.mxu1 %v490_v58 }
 0x3c2   :  { %868 = vmatmul.mubr.msk.f32.vlgmr.msra.gmra.mrb[4].mxu0 %vm390_vm3, %v411_v57  ;;  %922 = vmatprep.subr.bf16.mxu1 %v921_v3 }
 0x3c3   :  { %v957_v59 = vpop.eup %956  ;;  %916 = vmatpush3.bf16.msra.mxu0 %v913_v54 }
 0x3c4   :  { %v412_v60 = vmul.f32 %v957_v59, %v953_v48  ;;  %918 = vmatprep.subr.bf16.mxu0 %v917_v63 }
 0x3c6   :  { %873 = vmatmul.mubr.msk.f32.vlgmr.msra.gmra.mrb[2].mxu1 %vm390_vm3, %v412_v60 }
 0x3c7   :  { %920 = vmatpush3.bf16.msra.mxu0 %v917_v63  ;;  %924 = vmatpush3.bf16.msra.mxu1 %v921_v3 }
 0x3c8   :  { %926 = vmatprep.subr.bf16.mxu1 %v925_v5 }
 0x3cb   :  { %928 = vmatpush3.bf16.msra.mxu1 %v925_v5 }
 0x3cc   :  { %930 = vmatprep.subr.bf16.mxu1 %v929_v8 }
 0x3cf   :  { %932 = vmatpush3.bf16.msra.mxu1 %v929_v8 }
 0x3d0   :  { %934 = vmatprep.subr.bf16.mxu1 %v933_v15 }
 0x3d3   :  { %936 = vmatpush3.bf16.msra.mxu1 %v933_v15 }
 0x495   :  { %v485_v9 = vpop.f32.mrb[4].mxu0 }
 0x496   :  { %v869_v10 = vpop.f32.mrb[5].mxu0  ;;  %883 = vmatprep.mubr.msk.f32.mxu0 %vm109_vm0, %v485_v9 }
 0x499   :  { %v561_v11 = vpop.f32.mrb[2].mxu1 }
 0x49a   :  { %v874_v12 = vpop.f32.mrb[3].mxu1  ;;  %884 = vmatmul.mubr.msk.f32.vlgmr.msra.gmra.mrb[6].mxu0 %vm109_vm0, %v561_v11 }
 0x56d   :  { %v885_v17 = vpop.f32.mrb[6].mxu0 }
 0x56e   :  { %v654_v18 = vadd.f32 %v885_v17, %v808_v16  ;;  %v648_v19 = vpop.f32.mrb[7].mxu0 }
 0x56f   :  { %v649_v20 = vadd.f32 %v808_v16, %v648_v19 }
 0x570   :  { %v658_v22 = vmax.f32 %v654_v18, 0.0 }
 0x571   :  { %v657_v21 = vmax.f32 %v649_v20, 0.0 }
 0x573   :  { %902 = vmatprep.mubr.msk.f32.mxu1 %vm674_vm4, %v657_v21 }
 0x574   :  { %903 = vmatmul.mubr.msk.f32.vlgmr.msra.gmra.mrb[4].mxu1 %vm674_vm4, %v658_v22 }
 0x647   :  { %v904_v25 = vpop.f32.mrb[4].mxu1 }
 0x648   :  { %v753_v26 = vadd.f32 %v904_v25, %v811_v24  ;;  %v747_v27 = vpop.f32.mrb[5].mxu1 }
 0x649   :  { %v748_v28 = vadd.f32 %v811_v24, %v747_v27 }
 0x64a   :  { %v758_v29 = vsel %vm756_vm5, %v753_v26, -1e+30 }
 0x64b   :  { %761 = vmax.xlane.f32.xlu0 %v758_v29  ;;  %v757_v30 = vsel %vm756_vm5, %v748_v28, -1e+30 }
 0x64c   :  { %759 = vmax.xlane.f32.xlu1 %v757_v30 }
 0x6d8   :  { %v762_v31 = vpop.xlane.xlu0 %761 }
 0x6d9   :  { %v760_v32 = vpop.xlane.xlu1 %759  ;;  %v764_v33 = vsub.f32 %v758_v29, %v762_v31 }
 0x6da   :  { %v763_v34 = vsub.f32 %v757_v30, %v760_v32 }
 0x6db   :  { %v767_v36 = vmul.f32 1.442695, %v764_v33 }
 0x6dc   :  { %v765_v35 = vmul.f32 1.442695, %v763_v34 }
 0x6de   :  { %958 = vpow2.f32 %v765_v35 }
 0x6df   :  { %960 = vpow2.f32 %v767_v36 }
 0x6e8   :  { %v959_v37 = vpop.eup %958 }
 0x6e9   :  { %769 = vadd.xlane.f32.xlu0 %v959_v37  ;;  %v961_v38 = vpop.eup %960 }
 0x6ed   :  { %771 = vadd.xlane.f32.xlu0 %v961_v38 }
 0x776   :  { %v770_v23 = vpop.xlane.xlu0 %769 }
 0x777   :  { %962 = vrcp.f32 %v770_v23 }
 0x77a   :  { %v772_v39 = vpop.xlane.xlu0 %771 }
 0x77b   :  { %964 = vrcp.f32 %v772_v39 }
 0x781   :  { %v963_v40 = vpop.eup %962 }
 0x782   :  { %v775_v41 = vmul.f32 %v963_v40, %v959_v37 }
 0x784   :  { %777 = vst [vmem:[#allocation11] sm:$0xff] %v775_v41 }
 0x785   :  { %v965_v42 = vpop.eup %964 }
 0x786   :  { %v776_v43 = vmul.f32 %v965_v42, %v961_v38 }
 0x788   :  { %778 = vst [vmem:[#allocation11 + $0x8] sm:$0xff] %v776_v43 }
 0x789   :  { %1087 = shalt.err (!%p1084_p2)
}
 0x78a   :  { %s1088_s28 = scalar_lea.hbm %s1290_s8, 256 }
 0x78b   :  { %p1089_p3 = scmp.ne.s32.totalorder %s1290_s8, %s1088_s28  ;;  %p1092_p4 = scmp.lt.u32.totalorder %s1088_s28, %s1290_s8 }
 0x78d   :  { %p1094_p5 = pnand %p1092_p4, %p1089_p3 }
 0x78f   :  { %1097 = shalt.err (!%p1094_p5)
}
 0x790   :  { %790 = dma.vmem_to_hbm [thread:$0]  %s785_s7, 256, %s1290_s8, [#allocation4], %s1107_s15, %s1107_s15, %s1108_s16  }
 0x791   :  { %1104 = dma.done.wait [#allocation4], 256  }
 0x792   :  { %1105 = vsyncadd [#allocation4], 4294967040 }
 0x793   :  { %794 = vsyncpa [#allocation3], 1 }
 0x794   :  { %795 = vsyncpa [#allocation6], 1 }
 0x795   :  { %796 = vsyncpa [#allocation9], 1 }
 0x796   :  { %797 = vsyncpa [#allocation4], 1 }

</bundles_post_ra>
